<compile_context>
chip_gen: v7x
topology: tpu7x:2x2x1
jax: 0.10.0
libtpu: 0.0.40
codegen_flags: <defaults>
</compile_context>

<pallas_src>
import math
import jax
import jax.numpy as jnp
from jax.experimental import pallas as pl
from jax.experimental.pallas import tpu as pltpu


# ----------------------------- config ------------------------------------- #
NUMBER_OF_SPINS = 3       # D
NUMBER_OF_STATES = 4      # S
TIME_EMBED_DIM = 9        # E (odd -> zero-pad column in the reference)
HIDDEN_DIM = 50           # H
BATCH_SIZE = 5            # B (config.batch_size)
HALF_DIM = TIME_EMBED_DIM // 2
MAX_POSITIONS = 10000


# --------------------------- Pallas kernel -------------------------------- #
def _crm_rate_kernel(x_ref, t_ref, freqs_ref, wx_ref, ws_ref, wc_ref, b_ref,
                     o_ref):
    # sinusoidal timestep embedding, fused in-kernel (EUP: sin/cos are ~free)
    args = t_ref[...] * freqs_ref[...]                      # [tb,1]*[1,hf] -> [tb,hf]
    sin_e = jnp.sin(args)
    cos_e = jnp.cos(args)
    # fused linear layers: three *independent* tiny MXU contractions + one bias
    #   x @ (W1 @ W2_h)  +  sin(t*f) @ W2_t_sin  +  cos(t*f) @ W2_t_cos  + b_fused
    # (on v5e these K=3/4 dots could alternatively be VPU broadcast-FMAs; kept
    #  as dots for clarity since the kernel is overhead-bound either way)
    logits = (jnp.dot(x_ref[...], wx_ref[...], preferred_element_type=jnp.float32)
              + jnp.dot(sin_e, ws_ref[...], preferred_element_type=jnp.float32)
              + jnp.dot(cos_e, wc_ref[...], preferred_element_type=jnp.float32)
              + b_ref[...])
    o_ref[...] = jax.nn.softplus(logits)


# ------------------------------ wrapper ------------------------------------ #
@jax.jit
def conditional_backward_rate(x, times, params):
    """x: [B, D] float32, times: [B] float32 -> rates [B, D, S] float32."""
    B, D = x.shape
    S = NUMBER_OF_STATES
    DS = D * S
    HF = HALF_DIM

    x = x.astype(jnp.float32)
    times = times.astype(jnp.float32)

    # batch tile: 128 rows for large batches (lane/sublane-dense, amortizes
    # per-step overhead); round tiny batches up to a multiple of 8.
    if B >= 128:
        tb = 128
    else:
        tb = max(8, ((B + 7) // 8) * 8)
    b_pad = ((B + tb - 1) // tb) * tb
    if b_pad != B:
        x = jnp.pad(x, ((0, b_pad - B), (0, 0)))
        times = jnp.pad(times, ((0, b_pad - B),))
    t2 = times.reshape(b_pad, 1)

    grid = (b_pad // tb,)
    out = pl.pallas_call(
        _crm_rate_kernel,
        out_shape=jax.ShapeDtypeStruct((b_pad, DS), jnp.float32),
        grid_spec=pltpu.PrefetchScalarGridSpec(
            num_scalar_prefetch=0,
            grid=grid,
            in_specs=[
                pl.BlockSpec((tb, D), lambda i: (i, 0)),       # x tile
                pl.BlockSpec((tb, 1), lambda i: (i, 0)),       # times tile
                pl.BlockSpec((1, HF), lambda i: (0, 0)),       # frequencies
                pl.BlockSpec((D, DS), lambda i: (0, 0)),       # fused W_x
                pl.BlockSpec((HF, DS), lambda i: (0, 0)),      # W_t (sin part)
                pl.BlockSpec((HF, DS), lambda i: (0, 0)),      # W_t (cos part)
                pl.BlockSpec((1, DS), lambda i: (0, 0)),       # fused bias
            ],
            out_specs=pl.BlockSpec((tb, DS), lambda i: (i, 0)),
        ),
        compiler_params=pltpu.CompilerParams(
            dimension_semantics=("parallel",)),                # shards on v7x 2-TC
    )(x, t2, params["freqs"], params["w_fx"], params["w_ts"], params["w_tc"],
      params["b_fused"])

    return out[:B].reshape(B, D, S)


# ----------------- glue: timestep embedding (reference only) --------------- #
def transformer_timestep_embedding(timesteps, embedding_dim,
                                   max_positions=MAX_POSITIONS):
    half_dim = embedding_dim // 2
    emb = math.log(max_positions) / (half_dim - 1)
    freqs = jnp.exp(jnp.arange(half_dim, dtype=jnp.float32) * -emb)
    args = timesteps.astype(jnp.float32)[:, None] * freqs[None, :]
    emb = jnp.concatenate([jnp.sin(args), jnp.cos(args)], axis=1)
    if embedding_dim % 2 == 1:
        emb = jnp.pad(emb, ((0, 0), (0, 1)))
    return emb


# ----------------------- deterministic param init -------------------------- #
def init_raw_params(key):
    """Raw TemporalMLP params, weights stored [in_features, out_features]."""
    D, S, E, H = NUMBER_OF_SPINS, NUMBER_OF_STATES, TIME_EMBED_DIM, HIDDEN_DIM
    k1, k2, k3, k4 = jax.random.split(key, 4)

    def xavier_uniform(key, fan_in, fan_out):
        bound = math.sqrt(6.0 / (fan_in + fan_out))
        return jax.random.uniform(key, (fan_in, fan_out), jnp.float32,
                                  minval=-bound, maxval=bound)

    def bias_init(key, fan_in, fan_out):
        bound = 1.0 / math.sqrt(fan_in)           # torch Linear default bias init
        return jax.random.uniform(key, (1, fan_out), jnp.float32,
                                  minval=-bound, maxval=bound)

    return {
        "w1": xavier_uniform(k1, D, H),           # f1: D -> H
        "b1": bias_init(k2, D, H),
        "w2": xavier_uniform(k3, H + E, D * S),   # f2: H+E -> D*S
        "b2": bias_init(k4, H + E, D * S),
    }


def fuse_params(raw):
    """Collapse f1 into f2 (no activation in between) and drop the zero-pad row."""
    H, HF = HIDDEN_DIM, HALF_DIM
    w1, b1, w2, b2 = raw["w1"], raw["b1"], raw["w2"], raw["b2"]
    w2h = w2[:H, :]                               # multiplies hidden features
    w2t = w2[H:, :]                               # multiplies time embedding [E, DS]
    emb_scale = math.log(MAX_POSITIONS) / (HF - 1)
    freqs = jnp.exp(jnp.arange(HF, dtype=jnp.float32) * -emb_scale).reshape(1, HF)
    return {
        "w_fx": w1 @ w2h,                         # [D, D*S]
        "w_ts": w2t[:HF, :],                      # sin rows      [HF, D*S]
        "w_tc": w2t[HF:2 * HF, :],                # cos rows      [HF, D*S]
        # w2t[2*HF:, :] multiplies the odd-E zero-pad column -> contributes 0
        "b_fused": b1 @ w2h + b2,                 # [1, D*S]
        "freqs": freqs,                           # [1, HF]
    }


# --------------------------- pure-JAX reference ----------------------------- #
def reference_forward(x, times, raw):
    B, D = x.shape
    temb = transformer_timestep_embedding(times, TIME_EMBED_DIM)
    h = x @ raw["w1"] + raw["b1"]
    logits = jnp.concatenate([h, temb], axis=1) @ raw["w2"] + raw["b2"]
    return jax.nn.softplus(logits).reshape(B, D, NUMBER_OF_STATES)


# --------------------------------- main ------------------------------------ #
if __name__ == "__main__":
    key = jax.random.PRNGKey(0)
    kx, kt, kp = jax.random.split(key, 3)

    x = jax.random.normal(kx, (BATCH_SIZE, NUMBER_OF_SPINS), jnp.float32)
    times = jax.random.uniform(kt, (BATCH_SIZE,), jnp.float32)
    raw = init_raw_params(kp)
    params = fuse_params(raw)

    rates = conditional_backward_rate(x, times, params)
    rates = jax.block_until_ready(rates)

    assert rates.shape == (BATCH_SIZE, NUMBER_OF_SPINS, NUMBER_OF_STATES)
    assert rates.dtype == jnp.float32
    ref = reference_forward(x, times, raw)
    assert jnp.allclose(rates, ref, rtol=1e-4, atol=1e-5), "mismatch vs reference"
    # softplus output is non-negative (can underflow to exactly 0 for logits < -104)
    assert bool(jnp.all(rates >= 0))

    # exercise the batched / multi-tile "parallel" grid path as well
    kx2, kt2 = jax.random.split(jax.random.PRNGKey(1), 2)
    xb = jax.random.normal(kx2, (260, NUMBER_OF_SPINS), jnp.float32)
    tb = jax.random.uniform(kt2, (260,), jnp.float32)
    rates_b = jax.block_until_ready(conditional_backward_rate(xb, tb, params))
    ref_b = reference_forward(xb, tb, raw)
    assert rates_b.shape == (260, NUMBER_OF_SPINS, NUMBER_OF_STATES)
    assert jnp.allclose(rates_b, ref_b, rtol=1e-4, atol=1e-5), "batched mismatch"

    print("KERNEL_OK")
</pallas_src>

<mosaic_0001>
module attributes {stable_mosaic.version = 11 : i64} {
  func.func @_crm_rate_kernel(%arg0: i32, %arg1: memref<8x3xf32, #tpu.memory_space<vmem>>, %arg2: memref<8x1xf32, #tpu.memory_space<vmem>>, %arg3: memref<1x4xf32, #tpu.memory_space<vmem>>, %arg4: memref<3x12xf32, #tpu.memory_space<vmem>>, %arg5: memref<4x12xf32, #tpu.memory_space<vmem>>, %arg6: memref<4x12xf32, #tpu.memory_space<vmem>>, %arg7: memref<1x12xf32, #tpu.memory_space<vmem>>, %arg8: memref<8x12xf32, #tpu.memory_space<vmem>>) attributes {dimension_semantics = [#tpu.dimension_semantics<parallel>], iteration_bounds = array<i64: 1>, scalar_prefetch = 0 : i64, scratch_operands = 0 : i64, tpu.core_type = #tpu.core_type<tc>, window_params = [{transform_indices = @transform_0, window_bounds = array<i64: 8, 3>}, {transform_indices = @transform_1, window_bounds = array<i64: 8, 1>}, {pipeline_mode = #tpu.pipeline_mode<synchronous>, transform_indices = @transform_2, window_bounds = array<i64: 1, 4>}, {pipeline_mode = #tpu.pipeline_mode<synchronous>, transform_indices = @transform_3, window_bounds = array<i64: 3, 12>}, {pipeline_mode = #tpu.pipeline_mode<synchronous>, transform_indices = @transform_4, window_bounds = array<i64: 4, 12>}, {pipeline_mode = #tpu.pipeline_mode<synchronous>, transform_indices = @transform_5, window_bounds = array<i64: 4, 12>}, {pipeline_mode = #tpu.pipeline_mode<synchronous>, transform_indices = @transform_6, window_bounds = array<i64: 1, 12>}, {transform_indices = @transform_7, window_bounds = array<i64: 8, 12>}]} {
    %c0 = arith.constant 0 : index
    %c0_0 = arith.constant 0 : index
    %0 = vector.load %arg2[%c0, %c0_0] : memref<8x1xf32, #tpu.memory_space<vmem>>, vector<8x1xf32>
    %c0_1 = arith.constant 0 : index
    %c0_2 = arith.constant 0 : index
    %1 = vector.load %arg3[%c0_1, %c0_2] : memref<1x4xf32, #tpu.memory_space<vmem>>, vector<1x4xf32>
    %2 = vector.broadcast %0 : vector<8x1xf32> to vector<8x4xf32>
    %3 = vector.broadcast %1 : vector<1x4xf32> to vector<8x4xf32>
    %4 = arith.mulf %2, %3 : vector<8x4xf32>
    %5 = math.sin %4 : vector<8x4xf32>
    %6 = math.cos %4 : vector<8x4xf32>
    %c0_3 = arith.constant 0 : index
    %c0_4 = arith.constant 0 : index
    %7 = vector.load %arg1[%c0_3, %c0_4] : memref<8x3xf32, #tpu.memory_space<vmem>>, vector<8x3xf32>
    %c0_5 = arith.constant 0 : index
    %c0_6 = arith.constant 0 : index
    %8 = vector.load %arg4[%c0_5, %c0_6] : memref<3x12xf32, #tpu.memory_space<vmem>>, vector<3x12xf32>
    %cst = arith.constant dense<0.000000e+00> : vector<8x12xf32>
    %9 = tpu.matmul %7, %8, %cst {dimension_numbers = #tpu.dot_dimension_numbers<[1], [0], [0], [1], [0, 0, 1, 1], [], []>} : vector<8x3xf32>, vector<3x12xf32>, vector<8x12xf32> -> vector<8x12xf32>
    %c0_7 = arith.constant 0 : index
    %c0_8 = arith.constant 0 : index
    %10 = vector.load %arg5[%c0_7, %c0_8] : memref<4x12xf32, #tpu.memory_space<vmem>>, vector<4x12xf32>
    %cst_9 = arith.constant dense<0.000000e+00> : vector<8x12xf32>
    %11 = tpu.matmul %5, %10, %cst_9 {dimension_numbers = #tpu.dot_dimension_numbers<[1], [0], [0], [1], [0, 0, 1, 1], [], []>} : vector<8x4xf32>, vector<4x12xf32>, vector<8x12xf32> -> vector<8x12xf32>
    %12 = arith.addf %9, %11 : vector<8x12xf32>
    %c0_10 = arith.constant 0 : index
    %c0_11 = arith.constant 0 : index
    %13 = vector.load %arg6[%c0_10, %c0_11] : memref<4x12xf32, #tpu.memory_space<vmem>>, vector<4x12xf32>
    %cst_12 = arith.constant dense<0.000000e+00> : vector<8x12xf32>
    %14 = tpu.matmul %6, %13, %cst_12 {dimension_numbers = #tpu.dot_dimension_numbers<[1], [0], [0], [1], [0, 0, 1, 1], [], []>} : vector<8x4xf32>, vector<4x12xf32>, vector<8x12xf32> -> vector<8x12xf32>
    %15 = arith.addf %12, %14 : vector<8x12xf32>
    %c0_13 = arith.constant 0 : index
    %c0_14 = arith.constant 0 : index
    %16 = vector.load %arg7[%c0_13, %c0_14] : memref<1x12xf32, #tpu.memory_space<vmem>>, vector<1x12xf32>
    %17 = vector.broadcast %16 : vector<1x12xf32> to vector<8x12xf32>
    %18 = arith.addf %15, %17 : vector<8x12xf32>
    %cst_15 = arith.constant 0.000000e+00 : f32
    %19 = vector.broadcast %cst_15 : f32 to vector<8x12xf32>
    %20 = arith.maximumf %18, %19 : vector<8x12xf32>
    %21 = vector.broadcast %cst_15 : f32 to vector<8x12xf32>
    %22 = arith.subf %18, %21 : vector<8x12xf32>
    %23 = arith.cmpf one, %22, %22 : vector<8x12xf32>
    %24 = vector.broadcast %cst_15 : f32 to vector<8x12xf32>
    %25 = arith.addf %18, %24 : vector<8x12xf32>
    %26 = math.absf %22 : vector<8x12xf32>
    %cst_16 = arith.constant 0.000000e+00 : f32
    %27 = vector.broadcast %cst_16 : f32 to vector<8x12xf32>
    %28 = arith.subf %27, %26 : vector<8x12xf32>
    %29 = math.exp %28 : vector<8x12xf32>
    %30 = math.log1p %29 : vector<8x12xf32>
    %31 = arith.addf %20, %30 : vector<8x12xf32>
    %32 = arith.select %23, %25, %31 : vector<8x12xi1>, vector<8x12xf32>
    %c0_17 = arith.constant 0 : index
    %c0_18 = arith.constant 0 : index
    %33 = vector.load %arg8[%c0_17, %c0_18] : memref<8x12xf32, #tpu.memory_space<vmem>>, vector<8x12xf32>
    tpu.vector_store %arg8[%c0_17, %c0_18], %32 {strides = array<i32>} : memref<8x12xf32, #tpu.memory_space<vmem>>, vector<8x12xf32>,
    return
  }
  func.func @transform_0(%arg0: i32) -> (i32, i32) {
    %c0_i32 = arith.constant 0 : i32
    %c0_i32_0 = arith.constant 0 : i32
    return %arg0, %c0_i32 : i32, i32
  }
  func.func @transform_1(%arg0: i32) -> (i32, i32) {
    %c0_i32 = arith.constant 0 : i32
    %c0_i32_0 = arith.constant 0 : i32
    return %arg0, %c0_i32 : i32, i32
  }
  func.func @transform_2(%arg0: i32) -> (i32, i32) {
    %c0_i32 = arith.constant 0 : i32
    %c0_i32_0 = arith.constant 0 : i32
    %c0_i32_1 = arith.constant 0 : i32
    return %c0_i32, %c0_i32_0 : i32, i32
  }
  func.func @transform_3(%arg0: i32) -> (i32, i32) {
    %c0_i32 = arith.constant 0 : i32
    %c0_i32_0 = arith.constant 0 : i32
    %c0_i32_1 = arith.constant 0 : i32
    return %c0_i32, %c0_i32_0 : i32, i32
  }
  func.func @transform_4(%arg0: i32) -> (i32, i32) {
    %c0_i32 = arith.constant 0 : i32
    %c0_i32_0 = arith.constant 0 : i32
    %c0_i32_1 = arith.constant 0 : i32
    return %c0_i32, %c0_i32_0 : i32, i32
  }
  func.func @transform_5(%arg0: i32) -> (i32, i32) {
    %c0_i32 = arith.constant 0 : i32
    %c0_i32_0 = arith.constant 0 : i32
    %c0_i32_1 = arith.constant 0 : i32
    return %c0_i32, %c0_i32_0 : i32, i32
  }
  func.func @transform_6(%arg0: i32) -> (i32, i32) {
    %c0_i32 = arith.constant 0 : i32
    %c0_i32_0 = arith.constant 0 : i32
    %c0_i32_1 = arith.constant 0 : i32
    return %c0_i32, %c0_i32_0 : i32, i32
  }
  func.func @transform_7(%arg0: i32) -> (i32, i32) {
    %c0_i32 = arith.constant 0 : i32
    %c0_i32_0 = arith.constant 0 : i32
    return %arg0, %c0_i32 : i32, i32
  }
}

</mosaic_0001>

<bundles_post_ra>
// kernel: conditional_backward_rate.1
= control target key start
LH: loop header
LB: loop body
LE: loop exit
PB: predicated region body
PF: predicated region fallthrough
CT: control target
= control target key end

     0   :  { %v575_v0 = vmov 0   ;;  %vm254_vm0 = vcmask 1043456   ;;  %vm332_vm1 = vcmask 1042432   ;;  %v576_v2 = vmov 0.0   ;;  %s682_s1 = inlined_call_operand.vmem [shape: f32[8,1], index: 1, kind: input, shape index: {}]   ;;  %s683_s4 = inlined_call_operand.vmem [shape: f32[4,12], index: 4, kind: input, shape index: {}]   ;;  %s684_s3 = inlined_call_operand.vmem [shape: f32[3,12], index: 3, kind: input, shape index: {}]   ;;  %s685_s0 = inlined_call_operand.vmem [shape: f32[8,3], index: 0, kind: input, shape index: {}]   ;;  %s686_s2 = inlined_call_operand.vmem [shape: f32[1,4], index: 2, kind: input, shape index: {}]   ;;  %s687_s5 = inlined_call_operand.vmem [shape: f32[4,12], index: 5, kind: input, shape index: {}]   ;;  %s688_s6 = inlined_call_operand.vmem [shape: f32[1,12], index: 6, kind: input, shape index: {}]   ;;  %s689_s7 = inlined_call_operand.vmem [shape: f32[8,12], index: 7, kind: output, shape index: {}]  }
   0x1   :  { %566 = vset.pattern.permute.xlu0 %v575_v0  ;;  %v26_v1 = vld [vmem:[%s682_s1] sm:$0xff]  ;;  %538 = vmatprep.subr.mxu0 %v576_v2  ;;  %vm577_vm2 = vmmov 0   ;;  %vm328_vm3 = vcmask 23552   ;;  %v578_v19 = vmov 683565275   ;;  %vm250_vm14 = vcmask 31744  }
   0x2   :  { %30 = vperm.xlu0 %566, %v26_v1   ;;  %v249_v3 = vld [vmem:[%s683_s4] sm:$0xf]  ;;  %543 = vmatprep.subr.mxu1 %v576_v2  ;;  %v579_v21 = vmov 2475754826   ;;  %v580_v24 = vmov 2131351028  }
   0x3   :  { %v248_v4 = vld [vmem:[%s684_s3] sm:$0x7]  ;;  %539 = vmatpush3.msk.msra.mxu0 %vm254_vm0, %v249_v3  ;;  %540 = vmatprep.mubr.msk.f32.mxu0 %vm577_vm2, %v576_v2  ;;  %v581_v27 = vmov 2102212464   ;;  %v582_v30 = vmov 920167782  }
   0x4   :  { %544 = vmatpush3.msk.msra.mxu1 %vm332_vm1, %v248_v4  ;;  %545 = vmatprep.mubr.msk.f32.mxu1 %vm577_vm2, %v576_v2  ;;  %v247_v5 = vld [vmem:[%s685_s0] sm:$0xff]  ;;  %v583_v33 = vmov 1326507024  }
   0x5   :  { %548 = vmatprep.subr.mxu0 %v576_v2  ;;  %546 = vmatmul.mubr.msk.f32.vlgmr.msra.gmra.mrb[0].mxu1 %vm328_vm3, %v247_v5  ;;  %v516_v6 = vld [vmem:[%s686_s2] ss:$0 sm:$0xff] }
  0x81   :  { %v31_v7 = vpop.permute.xlu0 %30 }
  0x82   :  { %v647_v8 = vmul.f32 %v516_v6, %v31_v7 }
  0x84   :  { %v43_v9 = vand.u32 2139095040, %v647_v8  ;;  %v40_v13 = vand.u32 2147483647, %v647_v8  ;;  %vm42_vm11 = vcmp.lt.s32.totalorder %v647_v8, 0 }
  0x86   :  { %v44_v10 = vshrl.u32 %v43_v9, 23  ;;  %v47_v16 = vand.u32 8388607, %v40_v13  ;;  %vm41_vm12 = vcmp.le.f32.partialorder %v40_v13, 0.7853982 }
  0x88   :  { %v517_v11 = vadd.s32 4294967169, %v44_v10  ;;  %v48_v35 = vor.u32 8388608, %v47_v16 }
  0x8a   :  { %v50_v12 = vadd.s32 1, %v517_v11  ;;  %v88_v49 = vshll.u32 %v48_v35, 8 }
  0x8c   :  { %vm51_vm4 = vcmp.gt.s32.totalorder %v50_v12, 0 }
  0x8d   :  { %v52_v14 = vsel %vm51_vm4, %v50_v12, 0 }
  0x8e   :  { %v54_v15 = vand.u32 31, %v52_v14  ;;  %v53_v18 = vshrl.u32 %v52_v14, 5 }
  0x90   :  { %v55_v17 = vsub.s32 32, %v54_v15  ;;  %v57_v20 = vshll.u32 %v578_v19, %v54_v15  ;;  %v60_v22 = vshll.u32 %v579_v21, %v54_v15  ;;  %v63_v26 = vshll.u32 %v580_v24, %v54_v15 }
  0x91   :  { %v66_v29 = vshll.u32 %v581_v27, %v54_v15  ;;  %v69_v32 = vshll.u32 %v582_v30, %v54_v15  ;;  %vm72_vm5 = vcmp.lt.s32.totalorder %v53_v18, 1  ;;  %vm75_vm6 = vcmp.lt.s32.totalorder %v53_v18, 4 }
  0x92   :  { %v58_v23 = vshrl.u32 %v579_v21, %v55_v17  ;;  %v61_v25 = vshrl.u32 %v580_v24, %v55_v17  ;;  %v64_v28 = vshrl.u32 %v581_v27, %v55_v17  ;;  %v67_v31 = vshrl.u32 %v582_v30, %v55_v17 }
  0x93   :  { %v70_v34 = vshrl.u32 %v583_v33, %v55_v17  ;;  %v56_v44 = vshrl.u32 %v578_v19, %v55_v17  ;;  %vm74_vm7 = vcmp.lt.s32.totalorder %v53_v18, 3  ;;  %vm73_vm8 = vcmp.lt.s32.totalorder %v53_v18, 2 }
  0x94   :  { %v59_v36 = vor.u32 %v58_v23, %v57_v20  ;;  %v62_v37 = vor.u32 %v61_v25, %v60_v22  ;;  %v65_v38 = vor.u32 %v64_v28, %v63_v26  ;;  %v68_v39 = vor.u32 %v67_v31, %v66_v29 }
  0x95   :  { %v71_v40 = vor.u32 %v70_v34, %v69_v32 }
  0x96   :  { %v77_v41 = vsel %vm75_vm6, %v65_v38, 2102212464  ;;  %v80_v42 = vsel %vm72_vm5, %v59_v36, %v62_v37  ;;  %v84_v43 = vsel %vm72_vm5, %v62_v37, %v65_v38  ;;  %v81_v45 = vsel %vm75_vm6, %v68_v39, 920167782 }
  0x97   :  { %v85_v46 = vsel %vm75_vm6, %v71_v40, 1326507024  ;;  %v82_v47 = vsel %vm74_vm7, %v65_v38, %v81_v45  ;;  %v76_v50 = vsel %vm72_vm5, %v56_v44, %v59_v36  ;;  %v78_v51 = vsel %vm74_vm7, %v62_v37, %v77_v41  ;;  %v406_v40 = vld [vmem:[%s687_s5] sm:$0xf] }
  0x98   :  { %v86_v48 = vsel %vm74_vm7, %v68_v39, %v85_v46  ;;  %v83_v52 = vsel %vm73_vm8, %v80_v42, %v82_v47  ;;  %v79_v58 = vsel %vm73_vm8, %v76_v50, %v78_v51  ;;  %vm132_vm5 = vweird.f32 %v647_v8 }
  0x99   :  { %v87_v53 = vsel %vm73_vm8, %v84_v43, %v86_v48  ;;  %v656_v56 = vmul.u32.u64.low %v88_v49, %v83_v52  ;;  %v657_v57 = vmul.u32.u64.high %v88_v49, %v83_v52, %v656_v56  ;;  %v95_v60 = vmul.u32 %v88_v49, %v79_v58 }
  0x9a   :  { %v653_v54 = vmul.u32.u64.low %v88_v49, %v87_v53  ;;  %v654_v55 = vmul.u32.u64.high %v88_v49, %v87_v53, %v653_v54  ;;  %v531_v49 = vld [vmem:[%s688_s6] ss:$0 sm:$0xff] }
  0x9b   :  { %v98_v59 = vadd.s32 1, %v657_v57 }
  0x9c   :  { %vm97_vm9 = vc.u32 %v654_v55, %v656_v56  ;;  %v96_v10 = vadd.s32 %v656_v56, %v654_v55 }
  0x9d   :  { %v99_v61 = vsel %vm97_vm9, %v98_v59, %v657_v57 }
  0x9e   :  { %v100_v62 = vadd.s32 %v99_v61, %v95_v60 }
  0xa0   :  { %v101_v63 = vadd.s32 536870912, %v100_v62 }
  0xa2   :  { %v102_v0 = vshrl.u32 %v101_v63, 30 }
  0xa4   :  { %v103_v1 = vshll.u32 %v102_v0, 30  ;;  %v126_v23 = vsub.s32 4, %v102_v0 }
  0xa6   :  { %v104_v3 = vsub.s32 %v100_v62, %v103_v1  ;;  %v127_v26 = vsel %vm42_vm11, %v126_v23, %v102_v0 }
  0xa7   :  { %v129_v28 = vsel %vm41_vm12, 0, %v127_v26 }
  0xa8   :  { %v106_v4 = vsub.s32 0, %v104_v3  ;;  %v133_v29 = vadd.s32 3, %v129_v28  ;;  %v237_v31 = vand.u32 3, %v129_v28 }
  0xaa   :  { %v518_v5 = vmin.u32 %v106_v4, %v104_v3  ;;  %v134_v30 = vand.u32 3, %v133_v29  ;;  %vm239_vm1 = vcmp.eq.s32.totalorder %v237_v31, 0  ;;  %vm242_vm3 = vcmp.eq.s32.totalorder %v237_v31, 2 }
  0xab   :  { %vm238_vm6 = vcmp.lt.s32.totalorder %v237_v31, 2 }
  0xac   :  { %v108_v6 = vclz %v518_v5  ;;  %vm139_vm13 = vcmp.eq.s32.totalorder %v134_v30, 2  ;;  %vm136_vm15 = vcmp.eq.s32.totalorder %v134_v30, 0  ;;  %vm135_vm4 = vcmp.lt.s32.totalorder %v134_v30, 2 }
  0xae   :  { %v519_v7 = vadd.s32 4294967294, %v108_v6 }
  0xb0   :  { %vm520_vm10 = vcmp.lt.s32.totalorder %v519_v7, 0 }
  0xb1   :  { %v111_v9 = vsel %vm520_vm10, 0, %v519_v7 }
  0xb2   :  { %v112_v11 = vsub.s32 32, %v111_v9  ;;  %v116_v12 = vsub.s32 4294967266, %v111_v9  ;;  %v113_v14 = vshll.u32 %v104_v3, %v111_v9 }
  0xb4   :  { %v114_v15 = vshrl.u32 %v96_v10, %v112_v11  ;;  %v117_v16 = vadd.s32 127, %v116_v12 }
  0xb6   :  { %v115_v17 = vor.u32 %v114_v15, %v113_v14  ;;  %v118_v18 = vshll.u32 %v117_v16, 23 }
  0xb8   :  { %v119_v19 = vor.u32 4788187, %v118_v18  ;;  %v122_v21 = vcvt.s32.f32 %v115_v17 }
  0xba   :  { %v120_v20 = vand.u32 2147483647, %v119_v19 }
  0xbc   :  { %v123_v22 = vmul.f32 %v122_v21, %v120_v20 }
  0xbe   :  { %v124_v24 = vxor.u32 2147483648, %v123_v22 }
  0xc0   :  { %v125_v25 = vsel %vm42_vm11, %v124_v24, %v123_v22 }
  0xc1   :  { %v128_v27 = vsel %vm41_vm12, %v647_v8, %v125_v25 }
  0xc2   :  { %567 = vcosq.f32 %v128_v27 }
  0xc3   :  { %569 = vsinq.f32 %v128_v27 }
  0xcc   :  { %v568_v32 = vpop.eup %567 }
  0xcd   :  { %v570_v33 = vpop.eup %569  ;;  %v140_v34 = vxor.u32 2147483648, %v568_v32 }
  0xce   :  { %v137_v35 = vxor.u32 2147483648, %v570_v33 }
  0xcf   :  { %v141_v36 = vsel %vm139_vm13, %v140_v34, %v570_v33  ;;  %v244_v38 = vsel %vm242_vm3, %v140_v34, %v570_v33 }
  0xd0   :  { %v138_v13 = vsel %vm136_vm15, %v568_v32, %v137_v35  ;;  %v241_v37 = vsel %vm239_vm1, %v568_v32, %v137_v35 }
  0xd1   :  { %v142_v39 = vsel %vm135_vm4, %v138_v13, %v141_v36  ;;  %v245_v42 = vsel %vm238_vm6, %v241_v37, %v244_v38 }
  0xd2   :  { %v143_v41 = vsel %vm132_vm5, nan, %v142_v39  ;;  %v246_v43 = vsel %vm132_vm5, nan, %v245_v42 }
  0xd3   :  { %541 = vmatmul.mubr.msk.f32.vlgmr.msra.gmra.mrb[0].mxu0 %vm250_vm14, %v143_v41 }
  0xd4   :  { %549 = vmatpush3.msk.msra.mxu0 %vm254_vm0, %v406_v40  ;;  %550 = vmatprep.mubr.msk.f32.mxu0 %vm577_vm2, %v576_v2  ;;  %vm510_vm2 = vcmask 97280  }
  0xd7   :  { %551 = vmatmul.mubr.msk.f32.vlgmr.msra.gmra.mrb[2].mxu0 %vm250_vm14, %v246_v43 }
  0xd8   :  { %v402_v44 = vpop.f32.mrb[0].mxu1 }
  0xd9   :  { %v547_v8 = vpop.f32.mrb[1].mxu1 }
 0x1a6   :  { %v324_v45 = vpop.f32.mrb[0].mxu0 }
 0x1a7   :  { %v403_v46 = vadd.f32 %v402_v44, %v324_v45  ;;  %v542_v47 = vpop.f32.mrb[1].mxu0 }
 0x1aa   :  { %v479_v48 = vpop.f32.mrb[2].mxu0 }
 0x1ab   :  { %v483_v50 = vadd.f32 %v479_v48, %v403_v46  ;;  %v552_v51 = vpop.f32.mrb[3].mxu0 }
 0x1ad   :  { %v491_v52 = vadd.f32 %v531_v49, %v483_v50 }
 0x1af   :  { %v495_v53 = vand.u32 2147483647, %v491_v52  ;;  %v492_v63 = vmax.f32 %v491_v52, 0.0  ;;  %vm493_vm7 = vcmp.ne.f32.partialorder %v491_v52, %v491_v52 }
 0x1b1   :  { %v496_v54 = vsub.f32 0.0, %v495_v53 }
 0x1b3   :  { %v497_v55 = vmul.f32 1.442695, %v496_v54 }
 0x1b5   :  { %571 = vpow2.f32 %v497_v55 }
 0x1bf   :  { %v572_v2 = vpop.eup %571 }
 0x1c0   :  { %v499_v56 = vadd.f32 1.0, %v572_v2  ;;  %v502_v57 = vmul.f32 -0.5, %v572_v2  ;;  %v505_v59 = vand.u32 2147483647, %v572_v2 }
 0x1c2   :  { %573 = vlog2.f32 %v499_v56  ;;  %v503_v58 = vadd.f32 1.0, %v502_v57  ;;  %vm506_vm0 = vcmp.lt.f32.partialorder %v505_v59, 0.0004427343 }
 0x1c4   :  { %v504_v62 = vmul.f32 %v572_v2, %v503_v58 }
 0x1cc   :  { %v574_v60 = vpop.eup %573 }
 0x1cd   :  { %v501_v61 = vmul.f32 0.6931472, %v574_v60 }
 0x1cf   :  { %v507_v0 = vsel %vm506_vm0, %v504_v62, %v501_v61 }
 0x1d0   :  { %v508_v1 = vadd.f32 %v507_v0, %v492_v63 }
 0x1d2   :  { %v509_v3 = vsel %vm493_vm7, %v491_v52, %v508_v1 }
 0x1d3   :  { %511 = vst.msk [vmem:[%s689_s7] sm:$0xff] %vm510_vm2, %v509_v3 }

</bundles_post_ra>
